<compile_context>
chip_gen: v7x
topology: tpu7x:2x2x1
jax: 0.10.0
libtpu: 0.0.40
codegen_flags: <defaults>
</compile_context>

<pallas_src>
import jax
import jax.numpy as jnp
from jax import lax
from jax.experimental import pallas as pl
from jax.experimental.pallas import tpu as pltpu


def _round_up(v, m):
    return ((v + m - 1) // m) * m


def conv_rowgemm_kernel(xa_ref, xh_ref, wt_ref, b_ref, o_ref, xcat_ref):
    """One (batch, row-block) grid step.

    xa_ref  : (TR, S2*Cin)        current block of input rows (bf16)
    xh_ref  : (8,  S2*Cin)        first 8 rows of the NEXT row block (halo, bf16)
    wt_ref  : (K*S2*Cin, NCp)     stacked banded (Toeplitz) weights, resident (bf16)
    b_ref   : (1, NCp)            bias tiled over (padded) output columns (f32)
    o_ref   : (TR, NCp)           output rows, lane-dense last dim (f32)
    xcat_ref: (TR, K*S2*Cin) VMEM K shifted copies of the input rows, side by side
    """
    TR, S2C = xa_ref.shape
    K = wt_ref.shape[0] // S2C

    # Build the fused-im2col LHS: slab k1 holds the input rows shifted down by k1, so
    # the whole conv collapses into ONE (TR, K*S2C) @ (K*S2C, NCp) GEMM.
    xcat_ref[:, 0:S2C] = xa_ref[...]
    for k1 in range(1, K):                              # static unroll, K is small (3)
        lo, hi = k1 * S2C, (k1 + 1) * S2C
        xcat_ref[0:TR - k1, lo:hi] = xa_ref[k1:TR, :]
        xcat_ref[TR - k1:TR, lo:hi] = xh_ref[0:k1, :]

    o_ref[...] = (
        jnp.dot(xcat_ref[...], wt_ref[...], preferred_element_type=jnp.float32)
        + b_ref[...].astype(jnp.float32)
    ).astype(o_ref.dtype)


def _toeplitz_weights(weight, S2, S2o_pad):
    """Stack conv weights (K,K,Cin,Cout) into one banded matrix of shape
    (K*S2*Cin, S2o_pad*Cout) with
      Wt[k1*S2*Cin + s2*Cin + ci, j*Cout + co] = weight[k1, s2-j, ci, co]
    for 0 <= s2-j < K, else 0 (columns j >= true S2o are zero padding, sliced off)."""
    K, _, Cin, Cout = weight.shape
    j_idx = jnp.arange(S2o_pad)
    s2_idx = jnp.arange(S2)
    k2 = s2_idx[:, None] - j_idx[None, :]                 # (S2, S2o_pad)
    valid = (k2 >= 0) & (k2 < K)
    k2c = jnp.clip(k2, 0, K - 1)
    wt = weight[:, k2c, :, :]                             # (K, S2, S2o_pad, Cin, Cout)
    wt = jnp.where(valid[None, :, :, None, None], wt, 0.0)
    wt = wt.transpose(0, 1, 3, 2, 4)                      # (K, S2, Cin, S2o_pad, Cout)
    return wt.reshape(K * S2 * Cin, S2o_pad * Cout)


def conv2d_forward(x, weight, bias, stride=(1, 1), row_block=None,
                   compute_dtype=jnp.bfloat16):
    """Forward pass of the Conv2d module (valid conv, stride 1, bias; no activation)."""
    N, S1, S2, Cin = x.shape
    K = weight.shape[0]
    Cout = weight.shape[-1]
    if tuple(stride) != (1, 1):
        # TODO(synk): general strides (module default is [1,1]) need an s2-strided
        # Toeplitz band and strided row blocks; not implemented here.
        raise NotImplementedError("only stride=(1, 1) is supported")
    if K - 1 > 8:
        raise NotImplementedError("halo block supports kernel_size <= 9")

    S1o = S1 - K + 1
    S2o = S2 - K + 1
    S2C = S2 * Cin
    S2op = _round_up(S2o, 8)           # pad output cols so NCp % 128 == 0 (Cout = 16)
    NCp = S2op * Cout
    KS2C = K * S2C
    in_b = jnp.dtype(compute_dtype).itemsize
    out_b = jnp.dtype(x.dtype).itemsize

    # ---- output-row tile (multiple of 8 sublanes) ----
    if row_block is None:
        row_block = min(512, _round_up(S1o, 8))
        if N == 1:  # keep >= 2 grid steps so both v7x TensorCores get work
            row_block = min(row_block, max(8, _round_up(int(pl.cdiv(S1o, 2)), 8)))
    TR = max(8, _round_up(int(row_block), 8))
    G = int(pl.cdiv(S1o, TR))          # grid steps along output rows
    RB8 = TR // 8                      # halo index stride on the 8-row-blocked view
    S1p = G * TR + 8                   # padded rows: full xa blocks + one halo block

    # ---- layout glue (cheap, wrapper-side; no 9x im2col buffer in HBM) ----
    xf = x.reshape(N, S1, S2C).astype(compute_dtype)
    xf = jnp.pad(xf, ((0, 0), (0, S1p - S1), (0, 0)))
    wt = _toeplitz_weights(weight, S2, S2op).astype(compute_dtype)   # (K*S2C, NCp)
    b2d = jnp.tile(bias.astype(jnp.float32), S2op).reshape(1, NCp)

    # ---- VMEM budget (generation-aware) + scheduler hints ----
    stream = 2 * ((TR + 8) * S2C * in_b + TR * NCp * out_b)          # double-buffered
    resident = 2 * (KS2C * NCp * in_b + NCp * 4) + TR * KS2C * in_b
    try:
        vmem_cap = int(pltpu.get_tpu_info().vmem_capacity_bytes)
    except Exception:
        vmem_cap = 128 * 2 ** 20
    vmem_limit = int(min(int(0.75 * vmem_cap),
                         max(8 * 2 ** 20, 2 * (stream + resident))))
    cost = pl.CostEstimate(
        flops=2 * N * G * TR * KS2C * NCp,               # executed banded-GEMM MACs
        transcendentals=0,
        bytes_accessed=int(N * G * ((TR + 8) * S2C * in_b + TR * NCp * out_b)
                           + KS2C * NCp * in_b + NCp * 4),
    )

    out_padded = pl.pallas_call(
        conv_rowgemm_kernel,
        out_shape=jax.ShapeDtypeStruct((N, G * TR, NCp), x.dtype),
        grid=(N, G),
        in_specs=[
            # current TR input rows
            pl.BlockSpec((None, TR, S2C), lambda n, r: (n, r, 0)),
            # 8-row halo: first rows of block r+1 (always in bounds: S1p = G*TR + 8)
            pl.BlockSpec((None, 8, S2C), lambda n, r: (n, (r + 1) * RB8, 0)),
            # resident stacked Toeplitz weights + bias (block index never changes)
            # TODO(synk): for large S2 the band is O(S2^2); add an output-column grid
            # axis and/or pl.Buffered(1) so resident weights fit v7x's 64 MiB VMEM.
            pl.BlockSpec((KS2C, NCp), lambda n, r: (0, 0)),
            pl.BlockSpec((1, NCp), lambda n, r: (0, 0)),
        ],
        out_specs=pl.BlockSpec((None, TR, NCp), lambda n, r: (n, r, 0)),
        scratch_shapes=[pltpu.VMEM((TR, KS2C), compute_dtype)],
        compiler_params=pltpu.CompilerParams(
            dimension_semantics=("parallel", "parallel"),
            vmem_limit_bytes=vmem_limit,
        ),
        cost_estimate=cost,
    )(xf, xf, wt, b2d)

    out = out_padded[:, :S1o, :S2o * Cout]
    return out.reshape(N, S1o, S2o, Cout)


if __name__ == "__main__":
    key = jax.random.PRNGKey(0)
    kx, kw, kb = jax.random.split(key, 3)

    # Module defaults: in_channels=3, out_channels=16, kernel_size=3, stride=[1,1]
    N, S1, S2, Cin, Cout, K = 2, 16, 16, 3, 16, 3

    x = jax.random.normal(kx, (N, S1, S2, Cin), dtype=jnp.float32)

    # Kaiming-uniform-like bounds, same parameter shapes as nn.Conv2d but stored HWIO
    # w.r.t. (S1, S2).  NOTE: to import real torch weights (Cout, Cin, kH, kW) one must
    # map weight[k1, k2, ci, co] = W_torch[co, ci, k2, k1], because the module's
    # permute(0,3,2,1) makes torch's kH act on S2 and kW on S1.
    fan_in = Cin * K * K
    bound = 1.0 / (fan_in ** 0.5)
    weight = jax.random.uniform(kw, (K, K, Cin, Cout), minval=-bound, maxval=bound,
                                dtype=jnp.float32)
    bias = jax.random.uniform(kb, (Cout,), minval=-bound, maxval=bound,
                              dtype=jnp.float32)

    # row_block=8 -> 2 row blocks per image: exercises the tiled grid and the halo path.
    out = conv2d_forward(x, weight, bias, row_block=8)
    out = jax.block_until_ready(out)

    assert out.shape == (N, S1 - K + 1, S2 - K + 1, Cout), out.shape

    # Cross-check against XLA's conv on the same bf16-rounded operands (the kernel
    # streams bf16 and accumulates in f32, so this isolates kernel bugs from the
    # intentional bf16 quantization of the streamed inputs/weights).
    xq = x.astype(jnp.bfloat16).astype(jnp.float32)
    wq = weight.astype(jnp.bfloat16).astype(jnp.float32)
    ref = lax.conv_general_dilated(
        xq, wq, window_strides=(1, 1), padding="VALID",
        dimension_numbers=("NHWC", "HWIO", "NHWC"),
        precision=lax.Precision.HIGHEST,
        preferred_element_type=jnp.float32,
    ) + bias.reshape(1, 1, 1, Cout)
    max_err = float(jnp.max(jnp.abs(out - ref)))
    assert jnp.allclose(out, ref, atol=2e-3, rtol=2e-3), f"mismatch vs lax conv: {max_err}"

    print("KERNEL_OK")
</pallas_src>

<mosaic_0001>
module attributes {stable_mosaic.version = 11 : i64} {
  func.func @conv_rowgemm_kernel(%arg0: i32, %arg1: i32, %arg2: memref<1x8x48xbf16, #tpu.memory_space<vmem>>, %arg3: memref<1x8x48xbf16, #tpu.memory_space<vmem>>, %arg4: memref<144x256xbf16, #tpu.memory_space<vmem>>, %arg5: memref<1x256xf32, #tpu.memory_space<vmem>>, %arg6: memref<1x8x256xf32, #tpu.memory_space<vmem>>, %arg7: memref<8x144xbf16, #tpu.memory_space<vmem>>) attributes {dimension_semantics = [#tpu.dimension_semantics<parallel>, #tpu.dimension_semantics<parallel>], iteration_bounds = array<i64: 2, 2>, scalar_prefetch = 0 : i64, scratch_operands = 1 : i64, tpu.core_type = #tpu.core_type<tc>, window_params = [{transform_indices = @transform_0, window_bounds = array<i64: 1, 8, 48>}, {transform_indices = @transform_1, window_bounds = array<i64: 1, 8, 48>}, {pipeline_mode = #tpu.pipeline_mode<synchronous>, transform_indices = @transform_2, window_bounds = array<i64: 144, 256>}, {pipeline_mode = #tpu.pipeline_mode<synchronous>, transform_indices = @transform_3, window_bounds = array<i64: 1, 256>}, {transform_indices = @transform_4, window_bounds = array<i64: 1, 8, 256>}]} {
    %c0 = arith.constant 0 : index
    %c0_0 = arith.constant 0 : index
    %c0_1 = arith.constant 0 : index
    %0 = vector.load %arg2[%c0, %c0_0, %c0_1] : memref<1x8x48xbf16, #tpu.memory_space<vmem>>, vector<1x8x48xbf16>
    %1 = vector.shape_cast %0 : vector<1x8x48xbf16> to vector<8x48xbf16>
    %c0_2 = arith.constant 0 : index
    %c0_3 = arith.constant 0 : index
    %2 = vector.load %arg7[%c0_2, %c0_3] : memref<8x144xbf16, #tpu.memory_space<vmem>>, vector<8x48xbf16>
    tpu.vector_store %arg7[%c0_2, %c0_3], %1 {strides = array<i32>} : memref<8x144xbf16, #tpu.memory_space<vmem>>, vector<8x48xbf16>,
    %c0_4 = arith.constant 0 : index
    %c1 = arith.constant 1 : index
    %c0_5 = arith.constant 0 : index
    %3 = vector.load %arg2[%c0_4, %c1, %c0_5] : memref<1x8x48xbf16, #tpu.memory_space<vmem>>, vector<1x7x48xbf16>
    %4 = vector.shape_cast %3 : vector<1x7x48xbf16> to vector<7x48xbf16>
    %c0_6 = arith.constant 0 : index
    %c48 = arith.constant 48 : index
    %5 = vector.load %arg7[%c0_6, %c48] : memref<8x144xbf16, #tpu.memory_space<vmem>>, vector<7x48xbf16>
    tpu.vector_store %arg7[%c0_6, %c48], %4 {strides = array<i32>} : memref<8x144xbf16, #tpu.memory_space<vmem>>, vector<7x48xbf16>,
    %c0_7 = arith.constant 0 : index
    %c0_8 = arith.constant 0 : index
    %c0_9 = arith.constant 0 : index
    %6 = vector.load %arg3[%c0_7, %c0_8, %c0_9] : memref<1x8x48xbf16, #tpu.memory_space<vmem>>, vector<1x1x48xbf16>
    %7 = vector.shape_cast %6 : vector<1x1x48xbf16> to vector<1x48xbf16>
    %c7 = arith.constant 7 : index
    %c48_10 = arith.constant 48 : index
    %8 = vector.load %arg7[%c7, %c48_10] : memref<8x144xbf16, #tpu.memory_space<vmem>>, vector<1x48xbf16>
    tpu.vector_store %arg7[%c7, %c48_10], %7 {strides = array<i32>} : memref<8x144xbf16, #tpu.memory_space<vmem>>, vector<1x48xbf16>,
    %c0_11 = arith.constant 0 : index
    %c2 = arith.constant 2 : index
    %c0_12 = arith.constant 0 : index
    %9 = vector.load %arg2[%c0_11, %c2, %c0_12] : memref<1x8x48xbf16, #tpu.memory_space<vmem>>, vector<1x6x48xbf16>
    %10 = vector.shape_cast %9 : vector<1x6x48xbf16> to vector<6x48xbf16>
    %c0_13 = arith.constant 0 : index
    %c96 = arith.constant 96 : index
    %11 = vector.load %arg7[%c0_13, %c96] : memref<8x144xbf16, #tpu.memory_space<vmem>>, vector<6x48xbf16>
    tpu.vector_store %arg7[%c0_13, %c96], %10 {strides = array<i32>} : memref<8x144xbf16, #tpu.memory_space<vmem>>, vector<6x48xbf16>,
    %c0_14 = arith.constant 0 : index
    %c0_15 = arith.constant 0 : index
    %c0_16 = arith.constant 0 : index
    %12 = vector.load %arg3[%c0_14, %c0_15, %c0_16] : memref<1x8x48xbf16, #tpu.memory_space<vmem>>, vector<1x2x48xbf16>
    %13 = vector.shape_cast %12 : vector<1x2x48xbf16> to vector<2x48xbf16>
    %c6 = arith.constant 6 : index
    %c96_17 = arith.constant 96 : index
    %14 = vector.load %arg7[%c6, %c96_17] : memref<8x144xbf16, #tpu.memory_space<vmem>>, vector<2x48xbf16>
    tpu.vector_store %arg7[%c6, %c96_17], %13 {strides = array<i32>} : memref<8x144xbf16, #tpu.memory_space<vmem>>, vector<2x48xbf16>,
    %c0_18 = arith.constant 0 : index
    %c0_19 = arith.constant 0 : index
    %15 = vector.load %arg7[%c0_18, %c0_19] : memref<8x144xbf16, #tpu.memory_space<vmem>>, vector<8x144xbf16>
    %c0_20 = arith.constant 0 : index
    %c0_21 = arith.constant 0 : index
    %16 = vector.load %arg4[%c0_20, %c0_21] : memref<144x256xbf16, #tpu.memory_space<vmem>>, vector<144x256xbf16>
    %cst = arith.constant dense<0.000000e+00> : vector<8x256xf32>
    %17 = tpu.matmul %15, %16, %cst {dimension_numbers = #tpu.dot_dimension_numbers<[1], [0], [0], [1], [0, 0, 1, 1], [], []>} : vector<8x144xbf16>, vector<144x256xbf16>, vector<8x256xf32> -> vector<8x256xf32>
    %c0_22 = arith.constant 0 : index
    %c0_23 = arith.constant 0 : index
    %18 = vector.load %arg5[%c0_22, %c0_23] : memref<1x256xf32, #tpu.memory_space<vmem>>, vector<1x256xf32>
    %19 = vector.broadcast %18 : vector<1x256xf32> to vector<8x256xf32>
    %20 = arith.addf %17, %19 : vector<8x256xf32>
    %c0_24 = arith.constant 0 : index
    %c0_25 = arith.constant 0 : index
    %c0_26 = arith.constant 0 : index
    %21 = vector.load %arg6[%c0_24, %c0_25, %c0_26] : memref<1x8x256xf32, #tpu.memory_space<vmem>>, vector<1x8x256xf32>
    %22 = vector.shape_cast %21 : vector<1x8x256xf32> to vector<8x256xf32>
    %23 = vector.shape_cast %20 : vector<8x256xf32> to vector<1x8x256xf32>
    tpu.vector_store %arg6[%c0_24, %c0_25, %c0_26], %23 {strides = array<i32>} : memref<1x8x256xf32, #tpu.memory_space<vmem>>, vector<1x8x256xf32>,
    return
  }
  func.func @transform_0(%arg0: i32, %arg1: i32) -> (i32, i32, i32) {
    %c0_i32 = arith.constant 0 : i32
    %c0_i32_0 = arith.constant 0 : i32
    return %arg0, %arg1, %c0_i32 : i32, i32, i32
  }
  func.func @transform_1(%arg0: i32, %arg1: i32) -> (i32, i32, i32) {
    %c1_i32 = arith.constant 1 : i32
    %0 = arith.addi %arg1, %c1_i32 : i32
    %c1_i32_0 = arith.constant 1 : i32
    %1 = arith.muli %0, %c1_i32_0 : i32
    %c0_i32 = arith.constant 0 : i32
    %c0_i32_1 = arith.constant 0 : i32
    return %arg0, %1, %c0_i32 : i32, i32, i32
  }
  func.func @transform_2(%arg0: i32, %arg1: i32) -> (i32, i32) {
    %c0_i32 = arith.constant 0 : i32
    %c0_i32_0 = arith.constant 0 : i32
    %c0_i32_1 = arith.constant 0 : i32
    return %c0_i32, %c0_i32_0 : i32, i32
  }
  func.func @transform_3(%arg0: i32, %arg1: i32) -> (i32, i32) {
    %c0_i32 = arith.constant 0 : i32
    %c0_i32_0 = arith.constant 0 : i32
    %c0_i32_1 = arith.constant 0 : i32
    return %c0_i32, %c0_i32_0 : i32, i32
  }
  func.func @transform_4(%arg0: i32, %arg1: i32) -> (i32, i32, i32) {
    %c0_i32 = arith.constant 0 : i32
    %c0_i32_0 = arith.constant 0 : i32
    return %arg0, %arg1, %c0_i32 : i32, i32, i32
  }
}

</mosaic_0001>

<bundles_post_ra>
// kernel: tpu_custom_call.1
= control target key start
LH: loop header
LB: loop body
LE: loop exit
PB: predicated region body
PF: predicated region fallthrough
CT: control target
= control target key end

     0   :  { %s1464_s0 = inlined_call_operand.hbm [shape: bf16[2,24,48], index: 0, kind: input, shape index: {}]   ;;  %s1465_s1 = inlined_call_operand.hbm [shape: bf16[2,24,48], index: 1, kind: input, shape index: {}]   ;;  %s1466_s2 = inlined_call_operand.hbm [shape: bf16[144,256], index: 2, kind: input, shape index: {}]   ;;  %s1467_s3 = inlined_call_operand.vmem [shape: f32[1,256], index: 3, kind: input, shape index: {}]   ;;  %s1468_s4 = inlined_call_operand.hbm [shape: f32[2,16,256], index: 4, kind: output, shape index: {}]  }
   0x1   :  { %1481 = sst [smem:[#allocation19_spill]] %s1466_s2 }
   0x2   :  { %1482 = sst [smem:[#allocation20_spill]] %s1467_s3 }
   0x3   :  { %1483 = sst [smem:[#allocation21_spill]] %s1468_s4 }
   0x4   :  { %9 = vsyncpa [#allocation4], 0 }
   0x5   :  { %11 = vsyncpa [#allocation4 + $0x1], 0 }
   0x6   :  { %12 = vsyncpa [#allocation7], 0 }
   0x7   :  { %14 = vsyncpa [#allocation7 + $0x1], 0 }
   0x8   :  { %15 = vsyncpa [#allocation5], 0 }
   0x9   :  { %17 = vsyncpa [#allocation5 + $0x1], 0  ;;  %s1113_s15 = smov 0   ;;  %s1115_s16 = smov 0  }
   0xa   :  { %s1117_s17 = smov 0   ;;  %s1119_s18 = smov 0  }
   0xb   :  { %s1121_s19 = smov 0   ;;  %s1123_s20 = smov 0  }
   0xc   :  { %s1125_s21 = smov 0   ;;  %s1127_s22 = smov 0  }
   0xd   :  { %s1129_s23 = smov 0   ;;  %s1131_s24 = smov 0  }
   0xe   :  { %s1133_s25 = smov 0  }
   0xf LB: > { %1484 = sst [smem:[#allocation14_spill]] %s1074_s24  ;;  %s1169_s26 = sadd.s32 4294967295, %s1078_s25   ;;  %s1078_s25 = sphi %s1133_s25, %s23_s25   ;;  %s1074_s24 = sphi %s1131_s24, %s1516_s24   ;;  %s1070_s23 = sphi %s1129_s23, %s1524_s23   ;;  %s1066_s22 = sphi %s1127_s22, %s1514_s22   ;;  %s1062_s21 = sphi %s1125_s21, %s1523_s21   ;;  %s1058_s20 = sphi %s1123_s20, %s1522_s20   ;;  %s1054_s19 = sphi %s1121_s19, %s1521_s19   ;;  %s1050_s18 = sphi %s1119_s18, %s1520_s18   ;;  %s1046_s17 = sphi %s1117_s17, %s1519_s17   ;;  %s1042_s16 = sphi %s1115_s16, %s1518_s16   ;;  %s1038_s15 = sphi %s1113_s15, %s1517_s15  }
  0x10   : > { %p667_p0 = scmp.ge.s32.totalorder %s1078_s25, 1  ;;  %p1469_p1 = scmp.eq.s32.totalorder %s1169_s26, 0 }
  0x11   : > { %p168_p2 = scmp.lt.s32.totalorder %s1078_s25, 5  ;;  %s1080_s28 = smov [#allocation8]  }
  0x12   : > { %s180_s29 = sshll.u32 %s1080_s28, 4  ;;  %s1487_s2 = sld [smem:[#allocation19_spill]]  ;;  %s181_s29 = int_to_ptr.vmem [resolvable:$true] %s180_s29 }
  0x13   : > { %p1174_p3 = pnand %p667_p0, %p168_p2 }
  0x15   : > { %s1485_s27 = scalar_select %p1174_p3, 1, 0 }
  0x16   : > { %p718_p4 = pneg %p1174_p3 }
  0x18   : > { %p1182_p5 = pnand %p718_p4, %p1469_p1  ;;  %s859_s7 = scalar_lea.hbm %s1487_s2, 2304 }
  0x19   : > { %p860_p6 = scmp.ne.s32.totalorder %s1487_s2, %s859_s7  ;;  %p866_p10 = scmp.lt.u32.totalorder %s859_s7, %s1487_s2 }
  0x1a   : > { %p861_p7 = pneg %p1182_p5 }
  0x1c   : > { %p862_p8 = pnand %p861_p7, %p860_p6 }
  0x1e   : > { %p863_p9 = pneg %p862_p8 }
  0x20   : > { %p868_p11 = pnand %p866_p10, %p863_p9 }
  0x22   : > { %871 = shalt.err (!%p868_p11)
}
  0x23   : > { %s872_s12 = scalar_lea.vmem %s181_s29, 2304  ;;  %p880_p2 = scmp.lt.s32.totalorder %s181_s29, %s181_s29 }
  0x24   : > { %p873_p12 = scmp.ne.s32.totalorder %s181_s29, %s872_s12  ;;  %p881_p4 = scmp.lt.s32.totalorder %s872_s12, %s872_s12 }
  0x26   : > { %p875_p13 = pnand %p873_p12, %p861_p7  ;;  %p882_p1 = por %p881_p4, %p880_p2 }
  0x28   : > { %p876_p0 = pneg %p875_p13 }
  0x2a   : > { %p883_p3 = pnand %p882_p1, %p876_p0 }
  0x2c   : > { %886 = shalt.err (!%p883_p3)
}
  0x2d   : > { %s1081_s13 = smov 128   ;;  %s1082_s14 = smov 8  }
  0x2e   : > { %721 = dma.hbm_to_vmem [thread:$0]  (!%p1182_p5), %s1487_s2, 2304, %s181_s29, [#allocation7], %s1081_s13, %s1081_s13, %s1082_s14  }
  0x2f   : > { %s666_s6 = sadd.s32 4294967294, %s1078_s25   ;;  %s32_s7 = sadd.s32 1, %s1070_s23 }
  0x30   : > { %s35_s8 = sadd.s32 1, %s1074_s24  ;;  %p33_p1 = scmp.ge.s32.totalorder %s32_s7, 2 }
  0x31   : > { %s44_s9 = sadd.s32 1, %s1058_s20  ;;  %p51_p3 = scmp.ne.s32.totalorder %s1058_s20, %s1054_s19 }
  0x32   : > { %p1478_p6 = scmp.eq.s32.totalorder %s1078_s25, 0  ;;  %s1526_s8 = smov (!%p33_p1, %s35_s8), %s1074_s24 }
  0x33   : > { %s1209_s10 = scalar_select %p33_p1, 0, %s32_s7  }
  0x34   : > { %p1219_p5 = por %p1478_p6, %p51_p3  ;;  %p37_p7 = scmp.ge.s32.totalorder %s1526_s8, 2 }
  0x35   : > { %1488 = sst [smem:[#allocation15_spill]] %s1209_s10  ;;  %s40_s30 = ssub.s32 %s1070_s23, %s1209_s10 }
  0x36   : > { %p57_p8 = scmp.ne.s32.totalorder %s1054_s19, %s1050_s18  ;;  %s68_s11 = sadd.s32 1, %s1209_s10 }
  0x37   : > { %p155_p9 = scmp.eq.s32.totalorder %s1169_s26, 3  ;;  %s1528_s8 = smov (%p37_p7, %s1526_s8), 0 }
  0x38   : > { %1490 = sst [smem:[#allocation16_spill]] %s1528_s8  ;;  %p1491_p10 = scmp.eq.s32.totalorder %s1169_s26, 0 }
  0x39   : > { %s70_s13 = ssub.s32 %s32_s7, %s68_s11  ;;  %s39_s14 = ssub.s32 %s1074_s24, %s1528_s8 }
  0x3a   : > { %p1234_p11 = por %p1491_p10, %p57_p8  ;;  %p1243_p12 = por %p155_p9, %p51_p3 }
  0x3b   : > { %s41_s5 = sor.u32 %s40_s30, %s39_s14  ;;  %s71_s2 = sor.u32 %s70_s13, %s39_s14 }
  0x3c   : > { %s1492_s12 = scalar_select %p1234_p11, 1, 0 }
  0x3d   : > { %s1493_s28 = scalar_select %p1243_p12, 1, 0 }
  0x3e   : > { %p42_p13 = scmp.eq.s32.totalorder %s41_s5, 0  ;;  %p1247_p0 = scmp.eq.s32.totalorder %s71_s2, 0 }
  0x3f   : > { %1494 = sst [smem:[#allocation17_spill]] %s1493_s28  ;;  %p161_p2 = scmp.eq.s32.totalorder %s666_s6, 3 }
  0x40   : > { %p1477_p4 = scmp.lt.s32.totalorder %s1078_s25, 4  ;;  %s197_s11 = sand.u32 1, %s1058_s20  }
  0x41   : > { %s1253_s4 = scalar_select %p42_p13, %s1058_s20, %s44_s9  }
  0x42   : > { %p1258_p1 = por %p161_p2, %p57_p8  ;;  %s670_s8 = sshll.u32 %s197_s11, 2 }
  0x43   : > { %1496 = sst [smem:[#allocation18_spill]] %s1253_s4  ;;  %s707_s3 = smul.u32 3, %s1074_s24 }
  0x44   : > { %s1497_s7 = scalar_select %p1258_p1, 1, 0 }
  0x45   : > { %s201_s28 = scalar_lea.vmem [#allocation3], %s670_s8  ;;  %p1268_p3 = pnand %p1477_p4, %p1219_p5 }
  0x46   : > { %s210_s30 = sshll.u32 %s201_s28, 4  ;;  %s206_s6 = sadd.s32 %s1070_s23, %s707_s3  ;;  %s1273_s30 = int_to_ptr.vmem [resolvable:$true] %s210_s30 }
  0x47   : > { %s671_s9 = sshll.u32 %s206_s6, 6  ;;  %s198_s28 = scalar_lea.sflag [#allocation4], %s197_s11 }
  0x48   : > { %s1278_s5 = scalar_lea.hbm %s1464_s0, %s671_s9  ;;  %s1283_s29 = scalar_lea.hbm %s1465_s1, %s671_s9 }
  0x49   : > { %s887_s4 = scalar_lea.hbm %s1278_s5, 64  ;;  %p889_p7 = pneg %p1268_p3 }
  0x4a   : > { %p888_p5 = scmp.ne.s32.totalorder %s1278_s5, %s887_s4  ;;  %s892_s13 = scalar_lea.hbm %s1464_s0, 384 }
  0x4b   : > { %p893_p10 = scmp.lt.u32.totalorder %s1278_s5, %s1464_s0  ;;  %p894_p13 = scmp.lt.u32.totalorder %s892_s13, %s887_s4 }
  0x4c   : > { %p890_p8 = pnand %p889_p7, %p888_p5  ;;  %p896_p4 = scmp.lt.u32.totalorder %s887_s4, %s1278_s5 }
  0x4d   : > { %p895_p2 = por %p894_p13, %p893_p10 }
  0x4e   : > { %p891_p9 = pneg %p890_p8 }
  0x4f   : > { %p897_p6 = por %p896_p4, %p895_p2 }
  0x51   : > { %p898_p1 = pnand %p897_p6, %p891_p9 }
  0x53   : > { %901 = shalt.err (!%p898_p1)
}
  0x54   : > { %s902_s11 = scalar_lea.vmem %s1273_s30, 64  ;;  %s1083_s9 = smov [#allocation3]  }
  0x55   : > { %p903_p5 = scmp.ne.s32.totalorder %s1273_s30, %s902_s11  ;;  %s907_s8 = sshll.u32 %s1083_s9, 4  ;;  %s908_s8 = int_to_ptr.vmem [resolvable:$false] %s907_s8 }
  0x56   : > { %s909_s3 = scalar_lea.vmem %s908_s8, 128  ;;  %p910_p11 = scmp.lt.s32.totalorder %s1273_s30, %s908_s8 }
  0x57   : > { %p905_p8 = pnand %p903_p5, %p889_p7  ;;  %p911_p10 = scmp.lt.s32.totalorder %s909_s3, %s902_s11 }
  0x59   : > { %p906_p12 = pneg %p905_p8  ;;  %p912_p13 = por %p911_p10, %p910_p11 }
  0x5b   : > { %p913_p4 = pnand %p912_p13, %p906_p12 }
  0x5d   : > { %916 = shalt.err (!%p913_p4)
}
  0x5e   : > { %725 = dma.hbm_to_vmem [thread:$0]  (!%p1268_p3), %s1278_s5, 64, %s1273_s30, %s198_s28  }
  0x5f   : > { %s74_s4 = sadd.s32 1, %s1046_s17  ;;  %p81_p6 = scmp.ne.s32.totalorder %s1046_s17, %s1042_s16 }
  0x60   : > { %s1316_s2 = scalar_select %p1247_p0, %s1046_s17, %s74_s4  }
  0x61   : > { %p1499_p11 = scmp.eq.s32.totalorder %s1078_s25, 0  ;;  %p87_p1 = scmp.ne.s32.totalorder %s1042_s16, %s1038_s15 }
  0x62   : > { %s217_s6 = sand.u32 1, %s1078_s25   ;;  %s219_s13 = sand.u32 1, %s1046_s17  }
  0x63   : > { %p83_p12 = por %p81_p6, %p1499_p11  ;;  %p1500_p7 = scmp.eq.s32.totalorder %s1169_s26, 0 }
  0x64   : > { %s672_s14 = sshll.u32 %s219_s13, 2  ;;  %s1331_s11 = scalar_lea.hbm %s1283_s29, 64 }
  0x65   : > { %p1326_p9 = por %p87_p1, %p1500_p7  ;;  %p1502_p3 = scmp.lt.s32.totalorder %s1078_s25, 4 }
  0x66   : > { %s221_s15 = scalar_lea.vmem [#allocation6], %s672_s14  ;;  %s218_s5 = scalar_lea.sflag [#allocation7], %s217_s6 }
  0x67   : > { %p1335_p2 = pnand %p1502_p3, %p83_p12  ;;  %s231_s30 = sshll.u32 %s221_s15, 4  ;;  %s1339_s30 = int_to_ptr.vmem [resolvable:$true] %s231_s30 }
  0x68   : > { %s947_s28 = scalar_lea.hbm %s1283_s29, 128  ;;  %s922_s3 = scalar_lea.hbm %s1465_s1, 384 }
  0x69   : > { %p918_p0 = scmp.ne.s32.totalorder %s1331_s11, %s947_s28  ;;  %p919_p5 = pneg %p1335_p2 }
  0x6a   : > { %p923_p13 = scmp.lt.u32.totalorder %s1331_s11, %s1465_s1  ;;  %p924_p4 = scmp.lt.u32.totalorder %s922_s3, %s947_s28 }
  0x6b   : > { %p920_p8 = pnand %p919_p5, %p918_p0  ;;  %p926_p11 = scmp.lt.u32.totalorder %s947_s28, %s1331_s11 }
  0x6c   : > { %p925_p6 = por %p924_p4, %p923_p13 }
  0x6d   : > { %p921_p10 = pneg %p920_p8 }
  0x6e   : > { %p927_p12 = por %p926_p11, %p925_p6 }
  0x70   : > { %p928_p1 = pnand %p927_p12, %p921_p10 }
  0x72   : > { %931 = shalt.err (!%p928_p1)
}
  0x73   : > { %s932_s29 = scalar_lea.vmem %s1339_s30, 64  ;;  %s1084_s6 = smov [#allocation6]  }
  0x74   : > { %p933_p7 = scmp.ne.s32.totalorder %s1339_s30, %s932_s29  ;;  %s937_s14 = sshll.u32 %s1084_s6, 4  ;;  %s938_s14 = int_to_ptr.vmem [resolvable:$false] %s937_s14 }
  0x75   : > { %s939_s15 = scalar_lea.vmem %s938_s14, 128  ;;  %p940_p8 = scmp.lt.s32.totalorder %s1339_s30, %s938_s14 }
  0x76   : > { %p935_p3 = pnand %p933_p7, %p919_p5  ;;  %p941_p13 = scmp.lt.s32.totalorder %s939_s15, %s932_s29 }
  0x78   : > { %p936_p0 = pneg %p935_p3  ;;  %p942_p4 = por %p941_p13, %p940_p8 }
  0x7a   : > { %p943_p6 = pnand %p942_p4, %p936_p0 }
  0x7c   : > { %946 = shalt.err (!%p943_p6)
}
  0x7d   : > { %728 = dma.hbm_to_vmem [thread:$0]  (!%p1335_p2), %s1331_s11, 64, %s1339_s30, %s218_s5  }
  0x7e   : > { %p1504_p10 = scmp.ne.s32.totalorder %s1485_s27, 0 }
  0x7f   : > { %s1369_s28 = sand.u32 (!%p1504_p10), 1, %s1054_s19   ;;  %p1505_p5 = scmp.ne.s32.totalorder (!%p1504_p10), %s1492_s12, 0 }
  0x80   : > { %240 = sbr.rel (%p1504_p10) target bundleno = 518 (0x206), region = 36  ;;  %s675_s9 = sshll.u32 (!%p1504_p10), %s1369_s28, 2 }
  0x81   : > { %s243_s8 = scalar_lea.sflag (!%p1504_p10), [#allocation4], %s1369_s28  ;;  %s1373_s3 = scalar_lea.vmem (!%p1504_p10), [#allocation3], %s675_s9 }
  0x87   : > { %1021 = dma.done.wait (%p1505_p5), %s243_s8, 64  }
  0x88   : > { %1023 = vsyncadd (%p1505_p5), %s243_s8, 4294967232  ;;  %s251_s27 = sand.u32 1, %s1169_s26   ;;  %s253_s11 = sand.u32 1, %s1042_s16  }
  0x89   : > { %s676_s10 = sshll.u32 %s253_s11, 2  ;;  %s252_s30 = scalar_lea.sflag [#allocation7], %s251_s27 }
  0x8a   : > { %s255_s5 = scalar_lea.vmem [#allocation6], %s676_s10 }
  0x8b   : > { %1025 = dma.done.wait (%p1326_p9), %s252_s30, 64  }
  0x8c   : > { %1027 = vsyncadd (%p1326_p9), %s252_s30, 4294967232  ;;  %p1506_p2 = scmp.eq.s32.totalorder %s1169_s26, 0 }
  0x8e   : > { %1029 = dma.done.wait (%p1506_p2), [#allocation7], 2304   ;;  %p1507_p11 = pmov %p1506_p2 }
  0x8f   : > { %v294_v0 = vld [vmem:[%s1373_s3] sm:$0xf]  ;;  %v341_v1 = vld [vmem:[%s255_s5] sm:$0x1]  ;;  %v830_v7 = vld [vmem:[#allocation8 + $0x4] ss:$8 sps:$4 sm:$0xff]   ;;  %v374_v48 = vlaneseq }
  0x90   : > { %1031 = vsyncadd (%p1507_p11), [#allocation7], 4294964992  ;;  %v296_v2 = vshrl.u32 %v294_v0, 16  ;;  %v299_v3 = vshll.u32 %v294_v0, 16  ;;  %v343_v4 = vrot.slane %v341_v1, 5  ;;  %s1085_s12 = smov 96   ;;  %484 = vmatprep.subr.bf16.mxu0 %v830_v7 }
  0x91   : > { %v313_v5 = vld [vmem:[%s255_s5] sm:$0x1]  ;;  %v832_v10 = vld [vmem:[#allocation8] ss:$8 sps:$4 sm:$0xff]   ;;  %v327_v14 = vld [vmem:[%s1373_s3] sm:$0xe] }
  0x92   : > { %v315_v6 = vshll.u32 %v313_v5, 16  ;;  %v298_v8 = vrot.slane %v296_v2, 4  ;;  %v301_v9 = vrot.slane %v299_v3, 5  ;;  %344 = vrot.lane.b32.xlu1 %v343_v4, %s1085_s12  ;;  %v833_v12 = vld [vmem:[#allocation8 + $0x14] ss:$8 sps:$4 sm:$0xff]   ;;  %485 = vmatpush1.bf16.msra.mxu0 %v832_v10  ;;  %vm292_vm0 = vcmask 388096  }
  0x93   : > { %v835_v15 = vld [vmem:[#allocation8 + $0x10] ss:$8 sps:$4 sm:$0xff]   ;;  %486 = vmatprep.subr.bf16.mxu0 %v833_v12  ;;  %v836_v16 = vld [vmem:[#allocation8 + $0x24] ss:$8 sps:$4 sm:$0xff]   ;;  %s1086_s26 = smov 48   ;;  %v679_v19 = vrot.slane %v327_v14, 9 }
  0x94   : > { %v317_v11 = vrot.slane %v315_v6, 5  ;;  %v302_v13 = vor.u32 %v301_v9, %v298_v8  ;;  %v291_v18 = vld [vmem:[%s1373_s3] sm:$0xf]  ;;  %v838_v20 = vld [vmem:[#allocation8 + $0x20] ss:$8 sps:$4 sm:$0xff]   ;;  %vm307_vm1 = vcmask 781696  }
  0x95   : > { %293 = vst.msk [vmem:[#allocation2] sm:$0xf] %vm292_vm0, %v291_v18  ;;  %v839_v21 = vld [vmem:[#allocation8 + $0x34] ss:$8 sps:$4 sm:$0xff]   ;;  %v841_v22 = vld [vmem:[#allocation8 + $0x30] ss:$8 sps:$4 sm:$0xff]  }
  0x96   : > { %v303_v17 = vrot.slane %v302_v13, 4  ;;  %318 = vrot.lane.b32.xlu1 %v317_v11, %s1086_s26  ;;  %487 = vmatpush1.bf16.msra.mxu0 %v835_v15  ;;  %v842_v23 = vld [vmem:[#allocation8 + $0x44] ss:$8 sps:$4 sm:$0xff]   ;;  %v844_v24 = vld [vmem:[#allocation8 + $0x40] ss:$8 sps:$4 sm:$0xff]   ;;  %vm337_vm4 = vcmask 1043200  }
  0x97   : > { %488 = vmatprep.subr.bf16.mxu0 %v836_v16  ;;  %v845_v25 = vld [vmem:[#allocation8 + $0x54] ss:$8 sps:$4 sm:$0xff]   ;;  %v847_v26 = vld [vmem:[#allocation8 + $0x50] ss:$8 sps:$4 sm:$0xff]   ;;  %v848_v27 = vld [vmem:[#allocation8 + $0x64] ss:$8 sps:$4 sm:$0xff]  }
  0x98   : > { %304 = vrot.lane.b32.xlu0 %v303_v17, %s1086_s26  ;;  %v850_v28 = vld [vmem:[#allocation8 + $0x60] ss:$8 sps:$4 sm:$0xff]   ;;  %v851_v29 = vld [vmem:[#allocation8 + $0x74] ss:$8 sps:$4 sm:$0xff]   ;;  %v853_v30 = vld [vmem:[#allocation8 + $0x70] ss:$8 sps:$4 sm:$0xff]  }
  0x99   : > { %v854_v31 = vld [vmem:[#allocation8 + $0x84] ss:$8 sps:$4 sm:$0xff]   ;;  %v856_v32 = vld [vmem:[#allocation8 + $0x80] ss:$8 sps:$4 sm:$0xff]   ;;  %vm308_vm2 = vsmask.f32 3328 }
  0x9a   : > { %489 = vmatpush1.bf16.msra.mxu0 %v838_v20  ;;  %vm309_vm3 = vmand %vm307_vm1, %vm308_vm2  ;;  %vm338_vm5 = vcmask 129028   ;;  %vm321_vm6 = vcmask 781699   ;;  %vm322_vm7 = vsmask.f32 7950  ;;  %vm334_vm9 = vcmask 785408   ;;  %s678_s24 = sshll.u32 %s1369_s28, 4 }
  0x9b   : > { %490 = vmatprep.subr.bf16.mxu0 %v839_v21  ;;  %vm339_vm8 = vmor %vm338_vm5, %vm337_vm4  ;;  %vm349_vm10 = vcmask 1044227   ;;  %vm350_vm11 = vcmask 130055   ;;  %vm480_vm14 = vcmask 130048   ;;  %v375_v49 = vshrl.u32 %v374_v48, 7  ;;  %s702_s4 = sshll.u32 %s1062_s21, 1  ;;  %s703_s13 = sshll.u32 %s1066_s22, 2 }
  0x9c   : > { %331 = vrot.lane.b32.xlu0 %v679_v19, %s1085_s12  ;;  %v310_v33 = vld [vmem:[#allocation2] sm:$0xf]  ;;  %vm323_vm12 = vmand %vm321_vm6, %vm322_vm7  ;;  %s1508_s14 = sld [smem:[#allocation20_spill]]  ;;  %s540_s15 = sadd.s32 %s703_s13, %s702_s4 }
  0x9d   : > { %vm351_vm13 = vmor %vm350_vm11, %vm349_vm10  ;;  %v376_v50 = vsub.s32 0, %v375_v49  ;;  %v380_v52 = vsub.s32 1, %v375_v49  ;;  %s704_s9 = sshll.u32 %s540_s15, 7  ;;  %s1509_s8 = sld [smem:[#allocation17_spill]] }
  0x9e   : > { %491 = vmatpush1.bf16.msra.mxu0 %v841_v22  ;;  %s288_s3 = scalar_lea.vmem [#allocation9], %s678_s24  ;;  %s1510_s11 = sld [smem:[#allocation21_spill]] }
  0x9f   : > { %492 = vmatprep.subr.bf16.mxu0 %v842_v23  ;;  %s544_s27 = sshll.u32 %s288_s3, 4  ;;  %s528_s30 = scalar_lea.sflag [#allocation5], %s1369_s28  ;;  %s1403_s27 = int_to_ptr.vmem [resolvable:$true] %s544_s27 }
  0xa0   : > { %s948_s5 = scalar_lea.vmem %s1403_s27, 256  ;;  %s1087_s12 = smov [#allocation9]  }
  0xa1   : > { %p949_p9 = scmp.ne.s32.totalorder %s1403_s27, %s948_s5  ;;  %s952_s26 = sshll.u32 %s1087_s12, 4  ;;  %s953_s26 = int_to_ptr.vmem [resolvable:$false] %s952_s26 }
  0xa2   : > { %493 = vmatpush1.bf16.msra.mxu0 %v844_v24  ;;  %v372_v51 = vld [vmem:[%s1508_s14] sm:$0x3]  ;;  %s954_s24 = scalar_lea.vmem %s953_s26, 512  ;;  %p955_p3 = scmp.lt.s32.totalorder %s1403_s27, %s953_s26 }
  0xa3   : > { %494 = vmatprep.subr.bf16.mxu0 %v845_v25  ;;  %v377_v53 = vrot.slane %v372_v51, %v376_v50  ;;  %v381_v54 = vrot.slane %v372_v51, %v380_v52  ;;  %p1511_p12 = scmp.ne.s32.totalorder %s1509_s8, 0  ;;  %p956_p0 = scmp.lt.s32.totalorder %s954_s24, %s948_s5 }
  0xa4   : > { %s1401_s10 = scalar_lea.hbm %s1510_s11, %s704_s9 }
  0xa5   : > { %p950_p1 = pnand %p949_p9, %p1511_p12  ;;  %p957_p8 = por %p956_p0, %p955_p3 }
  0xa6   : > { %495 = vmatpush1.bf16.msra.mxu0 %v847_v26 }
  0xa7   : > { %496 = vmatprep.subr.bf16.mxu0 %v848_v27  ;;  %p951_p7 = pneg %p950_p1 }
  0xa9   : > { %p958_p13 = pnand %p957_p8, %p951_p7 }
  0xaa   : > { %497 = vmatpush1.bf16.msra.mxu0 %v850_v28 }
  0xab   : > { %498 = vmatprep.subr.bf16.mxu0 %v851_v29 }
  0xae   : > { %499 = vmatpush1.bf16.msra.mxu0 %v853_v30 }
  0xaf   : > { %500 = vmatprep.subr.bf16.mxu0 %v854_v31 }
  0xb2   : > { %501 = vmatpush1.bf16.msra.mxu0 %v856_v32 }
 0x104   : > { %v345_v36 = vpop.permute.xlu1 %344 }
 0x105   : > { %v346_v39 = vrot.slane %v345_v36, 4 }
 0x107   : > { %v347_v44 = vsel %vm334_vm9, %v346_v39, %v345_v36 }
 0x108   : > { %v319_v41 = vpop.permute.xlu1 %318 }
 0x10a   : > { %v305_v34 = vpop.permute.xlu0 %304 }
 0x10b   : > { %v311_v35 = vsel %vm309_vm3, %v305_v34, %v310_v33 }
 0x10c   : > { %312 = vst [vmem:[#allocation2] sm:$0xf] %v311_v35 }
 0x10e   : > { %v332_v37 = vpop.permute.xlu0 %331 }
 0x10f   : > { %v333_v38 = vrot.slane %v332_v37, 4 }
 0x111   : > { %v335_v40 = vsel %vm334_vm9, %v333_v38, %v332_v37 }
 0x112   : > { %340 = vst.msk [vmem:[#allocation2] sm:$0x77] %vm339_vm8, %v335_v40 }
 0x113   : > { %v324_v42 = vld [vmem:[#allocation2] sm:$0x8] }
 0x114   : > { %v325_v43 = vsel %vm323_vm12, %v319_v41, %v324_v42 }
 0x115   : > { %326 = vst [vmem:[#allocation2] sm:$0x8] %v325_v43 }
 0x116   : > { %352 = vst.msk [vmem:[#allocation2] sm:$0x88] %vm351_vm13, %v347_v44 }
 0x11d   : > { %v353_v45 = vld [vmem:[#allocation2] sm:$0xff] }
 0x11e   : > { %v680_v46 = vcombine.low %v353_v45, %v353_v45  ;;  %v681_v47 = vcombine.high %v353_v45, %v353_v45 }
 0x120   : > { %700 = vmatprep.mubr.msk.bf16.mxu0 %vm480_vm14, %v681_v47 }
 0x121   : > { %517 = vmatmul.mubr.bf16.vlgmr.msra.gmra.mrb[0].mxu0 %v680_v46 }
 0x1f4   : > { %v518_v55 = vpop.f32.mrb[0].mxu0 }
 0x1f5   : > { %v519_v56 = vadd.f32 %v518_v55, %v377_v53  ;;  %v520_v57 = vpop.f32.mrb[1].mxu0 }
 0x1f6   : > { %v521_v58 = vadd.f32 %v520_v57, %v381_v54  ;;  %v522_v59 = vpop.f32.mrb[2].mxu0 }
 0x1f7   : > { %525 = vst [vmem:[%s288_s3] sm:$0xff] %v519_v56  ;;  %v523_v60 = vpop.f32.mrb[3].mxu0 }
 0x1f8   : > { %526 = vst [vmem:[%s288_s3 + $0x8] sm:$0xff] %v521_v58 }
 0x1f9   : > { %961 = shalt.err (!%p958_p13)
}
 0x1fa   : > { %s962_s28 = scalar_lea.hbm %s1401_s10, 256  ;;  %s966_s29 = scalar_lea.hbm %s1510_s11, 1024 }
 0x1fb   : > { %p963_p4 = scmp.ne.s32.totalorder %s1401_s10, %s962_s28  ;;  %p967_p5 = scmp.lt.u32.totalorder %s1401_s10, %s1510_s11 }
 0x1fc   : > { %p968_p2 = scmp.lt.u32.totalorder %s966_s29, %s962_s28  ;;  %p970_p9 = scmp.lt.u32.totalorder %s962_s28, %s1401_s10 }
 0x1fd   : > { %p964_p6 = pnand %p963_p4, %p1511_p12 }
 0x1fe   : > { %p969_p11 = por %p968_p2, %p967_p5 }
 0x1ff   : > { %p965_p10 = pneg %p964_p6 }
 0x200   : > { %p971_p1 = por %p970_p9, %p969_p11 }
 0x202   : > { %p972_p7 = pnand %p971_p1, %p965_p10 }
 0x204   : > { %975 = shalt.err (!%p972_p7)
}
 0x205   : > { %716 = dma.vmem_to_hbm [thread:$0]  (%p1511_p12), %s1403_s27, 256, %s1401_s10, %s528_s30  }
 0x206 PF: > { %p736_p3 = scmp.ge.s32.totalorder %s1078_s25, 2  ;;  %s556_s15 = sand.u32 1, %s1050_s18  }
 0x207   : > { %p1512_p0 = scmp.ne.s32.totalorder %s1497_s7, 0  ;;  %s557_s9 = scalar_lea.sflag [#allocation5], %s556_s15 }
 0x209   : > { %p730_p8 = pnand %p736_p3, %p1512_p0 }
 0x20b   : > { %1033 = dma.done.wait (!%p730_p8), %s557_s9, 256  }
 0x20c   : > { %1035 = vsyncadd (!%p730_p8), %s557_s9, 4294967040  ;;  %s23_s25 = sadd.s32 1, %s1078_s25   ;;  %s1513_s8 = sld [smem:[#allocation18_spill]] }
 0x20d   : > { %p20_p13 = scmp.ge.s32.totalorder %s23_s25, 6   ;;  %s1514_s22 = sld [smem:[#allocation14_spill]] }
 0x20e   : > { %s1515_s3 = sld [smem:[#allocation15_spill]]  ;;  %s1516_s24 = sld [smem:[#allocation16_spill]] }
 0x20f   : > { %s1517_s15 = smov %s1042_s16  ;;  %s1518_s16 = smov %s1046_s17 }
 0x210   : > { %s1519_s17 = smov %s1316_s2  ;;  %s1520_s18 = smov %s1054_s19 }
 0x211   : > { %s1521_s19 = smov %s1058_s20  ;;  %s1523_s21 = smov %s1070_s23 }
 0x212   : > { %s1522_s20 = smov %s1513_s8  ;;  %22 = sbr.rel (!%p20_p13) target bundleno = 15 (0xf), region = 98 }
 0x214   : > { %s1524_s23 = smov %s1515_s3 }
 0x219   :  { %562 = vsyncpa [#allocation4], 1 }
 0x21a   :  { %564 = vsyncpa [#allocation4 + $0x1], 1 }
 0x21b   :  { %565 = vsyncpa [#allocation7], 1 }
 0x21c   :  { %567 = vsyncpa [#allocation7 + $0x1], 1 }
 0x21d   :  { %568 = vsyncpa [#allocation5], 1 }
 0x21e   :  { %570 = vsyncpa [#allocation5 + $0x1], 1 }

</bundles_post_ra>
